<compile_context>
chip_gen: v7x
topology: tpu7x:2x2x1
jax: 0.10.0
libtpu: 0.0.40
codegen_flags: <defaults>
</compile_context>

<pallas_src>
import functools

import jax
import jax.numpy as jnp
from jax.experimental import pallas as pl
from jax.experimental.pallas import tpu as pltpu

EPS = 1e-5


# ---------------------------------------------------------------------------
# Kernel 1: 3x3 conv as 9 shifted matmuls + per-image BN partial sums.
#   ph_ref : (P*Hq, Wq, Cin) bf16   phase-decomposed, spatially padded input
#   w_ref  : (9, Cin, CP)     bf16   per-tap weight matrices
#   y_ref  : (M, CP)          f32    raw conv output (M = Ho*Wo)
#   st_ref : (2, CP)          f32    [sum, sumsq] over this image's pixels
# ---------------------------------------------------------------------------
def _conv_stats_kernel(ph_ref, w_ref, y_ref, st_ref, *, taps, hq, ho, wo):
    m = y_ref.shape[0]
    cin = ph_ref.shape[-1]
    y_ref[...] = jnp.zeros_like(y_ref)
    for t, (p, r0, c0) in enumerate(taps):
        r = p * hq + r0
        slab = ph_ref[r:r + ho, c0:c0 + wo, :].reshape(m, cin)
        y_ref[...] += jnp.dot(slab, w_ref[t], preferred_element_type=jnp.float32)
    acc = y_ref[...]
    st_ref[0:1, :] = jnp.sum(acc, axis=0, keepdims=True)
    st_ref[1:2, :] = jnp.sum(acc * acc, axis=0, keepdims=True)


def conv_stats(phases, w_taps, taps, hq, ho, wo):
    n, ph_rows, wq, cin = phases.shape
    cp = w_taps.shape[-1]
    m = ho * wo
    return pl.pallas_call(
        functools.partial(_conv_stats_kernel, taps=taps, hq=hq, ho=ho, wo=wo),
        out_shape=(jax.ShapeDtypeStruct((n, m, cp), jnp.float32),
                   jax.ShapeDtypeStruct((n, 2, cp), jnp.float32)),
        grid=(n,),
        in_specs=[pl.BlockSpec((None, ph_rows, wq, cin), lambda i: (i, 0, 0, 0)),
                  pl.BlockSpec((9, cin, cp), lambda i: (0, 0, 0))],
        out_specs=(pl.BlockSpec((None, m, cp), lambda i: (i, 0, 0)),
                   pl.BlockSpec((None, 2, cp), lambda i: (i, 0, 0))),
        compiler_params=pltpu.CompilerParams(dimension_semantics=("parallel",)),
    )(phases, w_taps)


# ---------------------------------------------------------------------------
# Kernel 2: BN1-apply (FMA) + ReLU + 3x3 conv2 (9 shifted matmuls) + BN2
# partial sums, all per image.  The normalized activation stays in VMEM.
# ---------------------------------------------------------------------------
def _bn_relu_conv_stats_kernel(y1_ref, sb_ref, w_ref, y2_ref, st_ref, pad_ref,
                               *, ho, wo):
    m, cp = y2_ref.shape
    scale = sb_ref[0:1, :]
    bias = sb_ref[1:2, :]
    act = jnp.maximum(y1_ref[...] * scale + bias, 0.0)        # BN1 + ReLU (f32)
    pad_ref[...] = jnp.zeros_like(pad_ref)                    # spatial zero pad
    pad_ref[1:1 + ho, 1:1 + wo, :] = act.reshape(ho, wo, cp)
    y2_ref[...] = jnp.zeros_like(y2_ref)
    for kh in range(3):
        for kw in range(3):
            slab = pad_ref[kh:kh + ho, kw:kw + wo, :].reshape(m, cp)
            y2_ref[...] += jnp.dot(slab.astype(jnp.bfloat16), w_ref[kh * 3 + kw],
                                   preferred_element_type=jnp.float32)
    acc = y2_ref[...]
    st_ref[0:1, :] = jnp.sum(acc, axis=0, keepdims=True)
    st_ref[1:2, :] = jnp.sum(acc * acc, axis=0, keepdims=True)


def bn_relu_conv_stats(y1, sb1, w_taps, ho, wo):
    n, m, cp = y1.shape
    return pl.pallas_call(
        functools.partial(_bn_relu_conv_stats_kernel, ho=ho, wo=wo),
        out_shape=(jax.ShapeDtypeStruct((n, m, cp), jnp.float32),
                   jax.ShapeDtypeStruct((n, 2, cp), jnp.float32)),
        grid=(n,),
        in_specs=[pl.BlockSpec((None, m, cp), lambda i: (i, 0, 0)),
                  pl.BlockSpec((2, cp), lambda i: (0, 0)),
                  pl.BlockSpec((9, cp, cp), lambda i: (0, 0, 0))],
        out_specs=(pl.BlockSpec((None, m, cp), lambda i: (i, 0, 0)),
                   pl.BlockSpec((None, 2, cp), lambda i: (i, 0, 0))),
        scratch_shapes=[pltpu.VMEM((ho + 2, wo + 2, cp), jnp.float32)],
        compiler_params=pltpu.CompilerParams(dimension_semantics=("parallel",)),
    )(y1, sb1, w_taps)


# ---------------------------------------------------------------------------
# Kernel 3: BN2-apply (FMA) + residual add + ReLU.
# ---------------------------------------------------------------------------
def _bn_add_relu_kernel(y_ref, sb_ref, res_ref, o_ref):
    scale = sb_ref[0:1, :]
    bias = sb_ref[1:2, :]
    o_ref[...] = jnp.maximum(y_ref[...] * scale + bias + res_ref[...], 0.0)


def bn_add_relu(y, sb, res):
    n, m, cp = y.shape
    return pl.pallas_call(
        _bn_add_relu_kernel,
        out_shape=jax.ShapeDtypeStruct((n, m, cp), jnp.float32),
        grid=(n,),
        in_specs=[pl.BlockSpec((None, m, cp), lambda i: (i, 0, 0)),
                  pl.BlockSpec((2, cp), lambda i: (0, 0)),
                  pl.BlockSpec((None, m, cp), lambda i: (i, 0, 0))],
        out_specs=pl.BlockSpec((None, m, cp), lambda i: (i, 0, 0)),
        compiler_params=pltpu.CompilerParams(dimension_semantics=("parallel",)),
    )(y, sb, res)


# ---------------------------------------------------------------------------
# Wrapper glue (pure JAX; no duplicated data streams).
# ---------------------------------------------------------------------------
def _make_phases(x_nhwc, stride):
    """Spatially pad and (for stride 2) space-to-depth so that every conv tap
    is a unit-stride static slice inside the kernel."""
    n, h, w, c = x_nhwc.shape
    ho = (h - 1) // stride + 1
    wo = (w - 1) // stride + 1
    xp = jnp.pad(x_nhwc, ((0, 0), (1, 1), (1, 1), (0, 0)))
    if stride == 1:
        hq, wq = h + 2, w + 2
        phases = xp                                     # (N, Hq, Wq, C)
        taps = tuple((0, kh, kw) for kh in range(3) for kw in range(3))
    else:  # stride == 2
        hq, wq = ho + 1, wo + 1
        plist = []
        for a in range(2):
            for b in range(2):
                p = xp[:, a::2, b::2, :][:, :hq, :wq, :]
                p = jnp.pad(p, ((0, 0), (0, hq - p.shape[1]),
                                (0, wq - p.shape[2]), (0, 0)))
                plist.append(p)
        phases = jnp.concatenate(plist, axis=1)         # (N, 4*Hq, Wq, C)
        taps = tuple((2 * (kh % 2) + (kw % 2), kh // 2, kw // 2)
                     for kh in range(3) for kw in range(3))
    return phases.astype(jnp.bfloat16), taps, hq, ho, wo


def _weight_to_taps(w_oihw, cin_pad, cout_pad):
    """(Cout, Cin, 3, 3) -> (9, Cin_pad, Cout_pad) bf16, tap-major (kh,kw)."""
    cout, cin = w_oihw.shape[0], w_oihw.shape[1]
    w = jnp.transpose(w_oihw, (2, 3, 1, 0)).reshape(9, cin, cout)
    w = jnp.pad(w, ((0, 0), (0, cin_pad - cin), (0, cout_pad - cout)))
    return w.astype(jnp.bfloat16)


def _bn_scale_bias(stats, gamma, beta, count, cp):
    """Fold per-image (sum, sumsq) partials into packed (2, CP) scale/bias."""
    planes = gamma.shape[0]
    g = jnp.pad(gamma.astype(jnp.float32), (0, cp - planes))
    b = jnp.pad(beta.astype(jnp.float32), (0, cp - planes))
    tot = jnp.sum(stats, axis=0)                        # (2, CP)
    mean = tot[0] / count
    var = jnp.maximum(tot[1] / count - mean * mean, 0.0)
    scale = g * jax.lax.rsqrt(var + EPS)
    bias = b - mean * scale
    return jnp.stack([scale, bias], axis=0)             # (2, CP) f32


def basic_block_forward(x_nchw, params, stride):
    """BasicBlock.forward (BatchNorm in training mode). I/O in NCHW."""
    x = jnp.transpose(x_nchw, (0, 2, 3, 1)).astype(jnp.float32)   # -> NHWC
    n, h, w, in_planes = x.shape
    planes = params["w1"].shape[0]
    cp = ((planes + 127) // 128) * 128          # lane-dense channel padding

    # conv1 (+ BN1 partial stats)
    phases1, taps1, hq1, ho, wo = _make_phases(x, stride)
    w1 = _weight_to_taps(params["w1"], in_planes, cp)
    y1, st1 = conv_stats(phases1, w1, taps1, hq1, ho, wo)
    sb1 = _bn_scale_bias(st1, params["g1"], params["b1"], n * ho * wo, cp)

    # BN1-apply + ReLU + conv2 (+ BN2 partial stats), fully fused
    w2 = _weight_to_taps(params["w2"], cp, cp)
    y2, st2 = bn_relu_conv_stats(y1, sb1, w2, ho, wo)
    sb2 = _bn_scale_bias(st2, params["g2"], params["b2"], n * ho * wo, cp)

    # shortcut: option 'A' when shape changes, identity otherwise
    if stride != 1 or in_planes != planes:
        sc = x[:, ::2, ::2, :]
        pad_c = planes // 4
        sc = jnp.pad(sc, ((0, 0), (0, 0), (0, 0), (pad_c, pad_c)))
    else:
        sc = x
    sc = jnp.pad(sc, ((0, 0), (0, 0), (0, 0), (0, cp - sc.shape[-1])))
    res = sc.reshape(n, ho * wo, cp)

    # BN2-apply + residual add + ReLU
    out = bn_add_relu(y2, sb2, res)
    out = out.reshape(n, ho, wo, cp)[:, :, :, :planes]
    return jnp.transpose(out, (0, 3, 1, 2))             # -> NCHW


# ---------------------------------------------------------------------------
# Pure-JAX reference (for correctness check only).
# ---------------------------------------------------------------------------
def reference_forward(x_nchw, params, stride):
    def conv(x, w, s):
        return jax.lax.conv_general_dilated(
            x, w, (s, s), ((1, 1), (1, 1)),
            dimension_numbers=("NCHW", "OIHW", "NCHW"),
            precision=jax.lax.Precision.HIGHEST)

    def bn(x, g, b):
        mean = jnp.mean(x, axis=(0, 2, 3), keepdims=True)
        var = jnp.mean((x - mean) ** 2, axis=(0, 2, 3), keepdims=True)
        xhat = (x - mean) / jnp.sqrt(var + EPS)
        return xhat * g.reshape(1, -1, 1, 1) + b.reshape(1, -1, 1, 1)

    planes = params["w1"].shape[0]
    in_planes = x_nchw.shape[1]
    out = jnp.maximum(bn(conv(x_nchw, params["w1"], stride),
                         params["g1"], params["b1"]), 0.0)
    out = bn(conv(out, params["w2"], 1), params["g2"], params["b2"])
    if stride != 1 or in_planes != planes:
        sc = x_nchw[:, :, ::2, ::2]
        pad = planes // 4
        sc = jnp.pad(sc, ((0, 0), (pad, pad), (0, 0), (0, 0)))
    else:
        sc = x_nchw
    return jnp.maximum(out + sc, 0.0)


def _make_params(key, in_planes, planes):
    k = jax.random.split(key, 6)
    return {
        "w1": 0.1 * jax.random.normal(k[0], (planes, in_planes, 3, 3), jnp.float32),
        "g1": 1.0 + 0.1 * jax.random.normal(k[1], (planes,), jnp.float32),
        "b1": 0.1 * jax.random.normal(k[2], (planes,), jnp.float32),
        "w2": 0.1 * jax.random.normal(k[3], (planes, planes, 3, 3), jnp.float32),
        "g2": 1.0 + 0.1 * jax.random.normal(k[4], (planes,), jnp.float32),
        "b2": 0.1 * jax.random.normal(k[5], (planes,), jnp.float32),
    }


if __name__ == "__main__":
    key = jax.random.PRNGKey(0)
    kx1, kp1, kx2, kp2 = jax.random.split(key, 4)

    # Case 1: downsampling block: BasicBlock(16, 32, stride=2, option='A').
    n, in_planes, h, w, planes, stride = 2, 16, 16, 16, 32, 2
    x = jax.random.normal(kx1, (n, in_planes, h, w), jnp.float32)
    params = _make_params(kp1, in_planes, planes)
    out = jax.block_until_ready(basic_block_forward(x, params, stride))
    ref = jax.block_until_ready(reference_forward(x, params, stride))
    assert out.shape == (n, planes, h // 2, w // 2), out.shape
    err = float(jnp.max(jnp.abs(out - ref)))
    assert jnp.allclose(out, ref, atol=5e-2, rtol=5e-2), err

    # Case 2: identity block: BasicBlock(32, 32, stride=1).
    n, in_planes, h, w, planes, stride = 2, 32, 16, 16, 32, 1
    x = jax.random.normal(kx2, (n, in_planes, h, w), jnp.float32)
    params = _make_params(kp2, in_planes, planes)
    out = jax.block_until_ready(basic_block_forward(x, params, stride))
    ref = jax.block_until_ready(reference_forward(x, params, stride))
    assert out.shape == (n, planes, h, w), out.shape
    err = float(jnp.max(jnp.abs(out - ref)))
    assert jnp.allclose(out, ref, atol=5e-2, rtol=5e-2), err

    print("KERNEL_OK")
</pallas_src>

<mosaic_0001>
module attributes {stable_mosaic.version = 11 : i64} {
  func.func @_conv_stats_kernel(%arg0: i32, %arg1: memref<1x36x9x16xbf16, #tpu.memory_space<vmem>>, %arg2: memref<9x16x128xbf16, #tpu.memory_space<vmem>>, %arg3: memref<1x64x128xf32, #tpu.memory_space<vmem>>, %arg4: memref<1x2x128xf32, #tpu.memory_space<vmem>>) attributes {dimension_semantics = [#tpu.dimension_semantics<parallel>], iteration_bounds = array<i64: 2>, scalar_prefetch = 0 : i64, scratch_operands = 0 : i64, tpu.core_type = #tpu.core_type<tc>, window_params = [{transform_indices = @transform_0, window_bounds = array<i64: 1, 36, 9, 16>}, {pipeline_mode = #tpu.pipeline_mode<synchronous>, transform_indices = @transform_1, window_bounds = array<i64: 9, 16, 128>}, {transform_indices = @transform_2, window_bounds = array<i64: 1, 64, 128>}, {transform_indices = @transform_3, window_bounds = array<i64: 1, 2, 128>}]} {
    %cst = arith.constant 0.000000e+00 : f32
    %0 = vector.broadcast %cst : f32 to vector<64x128xf32>
    %c0 = arith.constant 0 : index
    %c0_0 = arith.constant 0 : index
    %c0_1 = arith.constant 0 : index
    %1 = vector.load %arg3[%c0, %c0_0, %c0_1] : memref<1x64x128xf32, #tpu.memory_space<vmem>>, vector<1x64x128xf32>
    %2 = vector.shape_cast %1 : vector<1x64x128xf32> to vector<64x128xf32>
    %3 = vector.shape_cast %0 : vector<64x128xf32> to vector<1x64x128xf32>
    tpu.vector_store %arg3[%c0, %c0_0, %c0_1], %3 {strides = array<i32>} : memref<1x64x128xf32, #tpu.memory_space<vmem>>, vector<1x64x128xf32>,
    %c0_2 = arith.constant 0 : index
    %c0_3 = arith.constant 0 : index
    %c0_4 = arith.constant 0 : index
    %c0_5 = arith.constant 0 : index
    %4 = vector.load %arg1[%c0_2, %c0_3, %c0_4, %c0_5] : memref<1x36x9x16xbf16, #tpu.memory_space<vmem>>, vector<1x8x8x16xbf16>
    %5 = vector.shape_cast %4 : vector<1x8x8x16xbf16> to vector<8x8x16xbf16>
    %6 = vector.shape_cast %5 : vector<8x8x16xbf16> to vector<64x16xbf16>
    %c0_6 = arith.constant 0 : index
    %c0_7 = arith.constant 0 : index
    %c0_8 = arith.constant 0 : index
    %7 = vector.load %arg3[%c0_6, %c0_7, %c0_8] : memref<1x64x128xf32, #tpu.memory_space<vmem>>, vector<1x64x128xf32>
    %8 = vector.shape_cast %7 : vector<1x64x128xf32> to vector<64x128xf32>
    %c0_9 = arith.constant 0 : index
    %c0_10 = arith.constant 0 : index
    %c0_11 = arith.constant 0 : index
    %9 = vector.load %arg2[%c0_9, %c0_10, %c0_11] : memref<9x16x128xbf16, #tpu.memory_space<vmem>>, vector<1x16x128xbf16>
    %10 = vector.shape_cast %9 : vector<1x16x128xbf16> to vector<16x128xbf16>
    %cst_12 = arith.constant dense<0.000000e+00> : vector<64x128xf32>
    %11 = tpu.matmul %6, %10, %cst_12 {dimension_numbers = #tpu.dot_dimension_numbers<[1], [0], [0], [1], [0, 0, 1, 1], [], []>} : vector<64x16xbf16>, vector<16x128xbf16>, vector<64x128xf32> -> vector<64x128xf32>
    %12 = arith.addf %8, %11 : vector<64x128xf32>
    %c0_13 = arith.constant 0 : index
    %c0_14 = arith.constant 0 : index
    %c0_15 = arith.constant 0 : index
    %13 = vector.load %arg3[%c0_13, %c0_14, %c0_15] : memref<1x64x128xf32, #tpu.memory_space<vmem>>, vector<1x64x128xf32>
    %14 = vector.shape_cast %13 : vector<1x64x128xf32> to vector<64x128xf32>
    %15 = vector.shape_cast %12 : vector<64x128xf32> to vector<1x64x128xf32>
    tpu.vector_store %arg3[%c0_13, %c0_14, %c0_15], %15 {strides = array<i32>} : memref<1x64x128xf32, #tpu.memory_space<vmem>>, vector<1x64x128xf32>,
    %c0_16 = arith.constant 0 : index
    %c9 = arith.constant 9 : index
    %c0_17 = arith.constant 0 : index
    %c0_18 = arith.constant 0 : index
    %16 = vector.load %arg1[%c0_16, %c9, %c0_17, %c0_18] : memref<1x36x9x16xbf16, #tpu.memory_space<vmem>>, vector<1x8x8x16xbf16>
    %17 = vector.shape_cast %16 : vector<1x8x8x16xbf16> to vector<8x8x16xbf16>
    %18 = vector.shape_cast %17 : vector<8x8x16xbf16> to vector<64x16xbf16>
    %c0_19 = arith.constant 0 : index
    %c0_20 = arith.constant 0 : index
    %c0_21 = arith.constant 0 : index
    %19 = vector.load %arg3[%c0_19, %c0_20, %c0_21] : memref<1x64x128xf32, #tpu.memory_space<vmem>>, vector<1x64x128xf32>
    %20 = vector.shape_cast %19 : vector<1x64x128xf32> to vector<64x128xf32>
    %c1 = arith.constant 1 : index
    %c0_22 = arith.constant 0 : index
    %c0_23 = arith.constant 0 : index
    %21 = vector.load %arg2[%c1, %c0_22, %c0_23] : memref<9x16x128xbf16, #tpu.memory_space<vmem>>, vector<1x16x128xbf16>
    %22 = vector.shape_cast %21 : vector<1x16x128xbf16> to vector<16x128xbf16>
    %cst_24 = arith.constant dense<0.000000e+00> : vector<64x128xf32>
    %23 = tpu.matmul %18, %22, %cst_24 {dimension_numbers = #tpu.dot_dimension_numbers<[1], [0], [0], [1], [0, 0, 1, 1], [], []>} : vector<64x16xbf16>, vector<16x128xbf16>, vector<64x128xf32> -> vector<64x128xf32>
    %24 = arith.addf %20, %23 : vector<64x128xf32>
    %c0_25 = arith.constant 0 : index
    %c0_26 = arith.constant 0 : index
    %c0_27 = arith.constant 0 : index
    %25 = vector.load %arg3[%c0_25, %c0_26, %c0_27] : memref<1x64x128xf32, #tpu.memory_space<vmem>>, vector<1x64x128xf32>
    %26 = vector.shape_cast %25 : vector<1x64x128xf32> to vector<64x128xf32>
    %27 = vector.shape_cast %24 : vector<64x128xf32> to vector<1x64x128xf32>
    tpu.vector_store %arg3[%c0_25, %c0_26, %c0_27], %27 {strides = array<i32>} : memref<1x64x128xf32, #tpu.memory_space<vmem>>, vector<1x64x128xf32>,
    %c0_28 = arith.constant 0 : index
    %c0_29 = arith.constant 0 : index
    %c1_30 = arith.constant 1 : index
    %c0_31 = arith.constant 0 : index
    %28 = vector.load %arg1[%c0_28, %c0_29, %c1_30, %c0_31] : memref<1x36x9x16xbf16, #tpu.memory_space<vmem>>, vector<1x8x8x16xbf16>
    %29 = vector.shape_cast %28 : vector<1x8x8x16xbf16> to vector<8x8x16xbf16>
    %30 = vector.shape_cast %29 : vector<8x8x16xbf16> to vector<64x16xbf16>
    %c0_32 = arith.constant 0 : index
    %c0_33 = arith.constant 0 : index
    %c0_34 = arith.constant 0 : index
    %31 = vector.load %arg3[%c0_32, %c0_33, %c0_34] : memref<1x64x128xf32, #tpu.memory_space<vmem>>, vector<1x64x128xf32>
    %32 = vector.shape_cast %31 : vector<1x64x128xf32> to vector<64x128xf32>
    %c2 = arith.constant 2 : index
    %c0_35 = arith.constant 0 : index
    %c0_36 = arith.constant 0 : index
    %33 = vector.load %arg2[%c2, %c0_35, %c0_36] : memref<9x16x128xbf16, #tpu.memory_space<vmem>>, vector<1x16x128xbf16>
    %34 = vector.shape_cast %33 : vector<1x16x128xbf16> to vector<16x128xbf16>
    %cst_37 = arith.constant dense<0.000000e+00> : vector<64x128xf32>
    %35 = tpu.matmul %30, %34, %cst_37 {dimension_numbers = #tpu.dot_dimension_numbers<[1], [0], [0], [1], [0, 0, 1, 1], [], []>} : vector<64x16xbf16>, vector<16x128xbf16>, vector<64x128xf32> -> vector<64x128xf32>
    %36 = arith.addf %32, %35 : vector<64x128xf32>
    %c0_38 = arith.constant 0 : index
    %c0_39 = arith.constant 0 : index
    %c0_40 = arith.constant 0 : index
    %37 = vector.load %arg3[%c0_38, %c0_39, %c0_40] : memref<1x64x128xf32, #tpu.memory_space<vmem>>, vector<1x64x128xf32>
    %38 = vector.shape_cast %37 : vector<1x64x128xf32> to vector<64x128xf32>
    %39 = vector.shape_cast %36 : vector<64x128xf32> to vector<1x64x128xf32>
    tpu.vector_store %arg3[%c0_38, %c0_39, %c0_40], %39 {strides = array<i32>} : memref<1x64x128xf32, #tpu.memory_space<vmem>>, vector<1x64x128xf32>,
    %c0_41 = arith.constant 0 : index
    %c18 = arith.constant 18 : index
    %c0_42 = arith.constant 0 : index
    %c0_43 = arith.constant 0 : index
    %40 = vector.load %arg1[%c0_41, %c18, %c0_42, %c0_43] : memref<1x36x9x16xbf16, #tpu.memory_space<vmem>>, vector<1x8x8x16xbf16>
    %41 = vector.shape_cast %40 : vector<1x8x8x16xbf16> to vector<8x8x16xbf16>
    %42 = vector.shape_cast %41 : vector<8x8x16xbf16> to vector<64x16xbf16>
    %c0_44 = arith.constant 0 : index
    %c0_45 = arith.constant 0 : index
    %c0_46 = arith.constant 0 : index
    %43 = vector.load %arg3[%c0_44, %c0_45, %c0_46] : memref<1x64x128xf32, #tpu.memory_space<vmem>>, vector<1x64x128xf32>
    %44 = vector.shape_cast %43 : vector<1x64x128xf32> to vector<64x128xf32>
    %c3 = arith.constant 3 : index
    %c0_47 = arith.constant 0 : index
    %c0_48 = arith.constant 0 : index
    %45 = vector.load %arg2[%c3, %c0_47, %c0_48] : memref<9x16x128xbf16, #tpu.memory_space<vmem>>, vector<1x16x128xbf16>
    %46 = vector.shape_cast %45 : vector<1x16x128xbf16> to vector<16x128xbf16>
    %cst_49 = arith.constant dense<0.000000e+00> : vector<64x128xf32>
    %47 = tpu.matmul %42, %46, %cst_49 {dimension_numbers = #tpu.dot_dimension_numbers<[1], [0], [0], [1], [0, 0, 1, 1], [], []>} : vector<64x16xbf16>, vector<16x128xbf16>, vector<64x128xf32> -> vector<64x128xf32>
    %48 = arith.addf %44, %47 : vector<64x128xf32>
    %c0_50 = arith.constant 0 : index
    %c0_51 = arith.constant 0 : index
    %c0_52 = arith.constant 0 : index
    %49 = vector.load %arg3[%c0_50, %c0_51, %c0_52] : memref<1x64x128xf32, #tpu.memory_space<vmem>>, vector<1x64x128xf32>
    %50 = vector.shape_cast %49 : vector<1x64x128xf32> to vector<64x128xf32>
    %51 = vector.shape_cast %48 : vector<64x128xf32> to vector<1x64x128xf32>
    tpu.vector_store %arg3[%c0_50, %c0_51, %c0_52], %51 {strides = array<i32>} : memref<1x64x128xf32, #tpu.memory_space<vmem>>, vector<1x64x128xf32>,
    %c0_53 = arith.constant 0 : index
    %c27 = arith.constant 27 : index
    %c0_54 = arith.constant 0 : index
    %c0_55 = arith.constant 0 : index
    %52 = vector.load %arg1[%c0_53, %c27, %c0_54, %c0_55] : memref<1x36x9x16xbf16, #tpu.memory_space<vmem>>, vector<1x8x8x16xbf16>
    %53 = vector.shape_cast %52 : vector<1x8x8x16xbf16> to vector<8x8x16xbf16>
    %54 = vector.shape_cast %53 : vector<8x8x16xbf16> to vector<64x16xbf16>
    %c0_56 = arith.constant 0 : index
    %c0_57 = arith.constant 0 : index
    %c0_58 = arith.constant 0 : index
    %55 = vector.load %arg3[%c0_56, %c0_57, %c0_58] : memref<1x64x128xf32, #tpu.memory_space<vmem>>, vector<1x64x128xf32>
    %56 = vector.shape_cast %55 : vector<1x64x128xf32> to vector<64x128xf32>
    %c4 = arith.constant 4 : index
    %c0_59 = arith.constant 0 : index
    %c0_60 = arith.constant 0 : index
    %57 = vector.load %arg2[%c4, %c0_59, %c0_60] : memref<9x16x128xbf16, #tpu.memory_space<vmem>>, vector<1x16x128xbf16>
    %58 = vector.shape_cast %57 : vector<1x16x128xbf16> to vector<16x128xbf16>
    %cst_61 = arith.constant dense<0.000000e+00> : vector<64x128xf32>
    %59 = tpu.matmul %54, %58, %cst_61 {dimension_numbers = #tpu.dot_dimension_numbers<[1], [0], [0], [1], [0, 0, 1, 1], [], []>} : vector<64x16xbf16>, vector<16x128xbf16>, vector<64x128xf32> -> vector<64x128xf32>
    %60 = arith.addf %56, %59 : vector<64x128xf32>
    %c0_62 = arith.constant 0 : index
    %c0_63 = arith.constant 0 : index
    %c0_64 = arith.constant 0 : index
    %61 = vector.load %arg3[%c0_62, %c0_63, %c0_64] : memref<1x64x128xf32, #tpu.memory_space<vmem>>, vector<1x64x128xf32>
    %62 = vector.shape_cast %61 : vector<1x64x128xf32> to vector<64x128xf32>
    %63 = vector.shape_cast %60 : vector<64x128xf32> to vector<1x64x128xf32>
    tpu.vector_store %arg3[%c0_62, %c0_63, %c0_64], %63 {strides = array<i32>} : memref<1x64x128xf32, #tpu.memory_space<vmem>>, vector<1x64x128xf32>,
    %c0_65 = arith.constant 0 : index
    %c18_66 = arith.constant 18 : index
    %c1_67 = arith.constant 1 : index
    %c0_68 = arith.constant 0 : index
    %64 = vector.load %arg1[%c0_65, %c18_66, %c1_67, %c0_68] : memref<1x36x9x16xbf16, #tpu.memory_space<vmem>>, vector<1x8x8x16xbf16>
    %65 = vector.shape_cast %64 : vector<1x8x8x16xbf16> to vector<8x8x16xbf16>
    %66 = vector.shape_cast %65 : vector<8x8x16xbf16> to vector<64x16xbf16>
    %c0_69 = arith.constant 0 : index
    %c0_70 = arith.constant 0 : index
    %c0_71 = arith.constant 0 : index
    %67 = vector.load %arg3[%c0_69, %c0_70, %c0_71] : memref<1x64x128xf32, #tpu.memory_space<vmem>>, vector<1x64x128xf32>
    %68 = vector.shape_cast %67 : vector<1x64x128xf32> to vector<64x128xf32>
    %c5 = arith.constant 5 : index
    %c0_72 = arith.constant 0 : index
    %c0_73 = arith.constant 0 : index
    %69 = vector.load %arg2[%c5, %c0_72, %c0_73] : memref<9x16x128xbf16, #tpu.memory_space<vmem>>, vector<1x16x128xbf16>
    %70 = vector.shape_cast %69 : vector<1x16x128xbf16> to vector<16x128xbf16>
    %cst_74 = arith.constant dense<0.000000e+00> : vector<64x128xf32>
    %71 = tpu.matmul %66, %70, %cst_74 {dimension_numbers = #tpu.dot_dimension_numbers<[1], [0], [0], [1], [0, 0, 1, 1], [], []>} : vector<64x16xbf16>, vector<16x128xbf16>, vector<64x128xf32> -> vector<64x128xf32>
    %72 = arith.addf %68, %71 : vector<64x128xf32>
    %c0_75 = arith.constant 0 : index
    %c0_76 = arith.constant 0 : index
    %c0_77 = arith.constant 0 : index
    %73 = vector.load %arg3[%c0_75, %c0_76, %c0_77] : memref<1x64x128xf32, #tpu.memory_space<vmem>>, vector<1x64x128xf32>
    %74 = vector.shape_cast %73 : vector<1x64x128xf32> to vector<64x128xf32>
    %75 = vector.shape_cast %72 : vector<64x128xf32> to vector<1x64x128xf32>
    tpu.vector_store %arg3[%c0_75, %c0_76, %c0_77], %75 {strides = array<i32>} : memref<1x64x128xf32, #tpu.memory_space<vmem>>, vector<1x64x128xf32>,
    %c0_78 = arith.constant 0 : index
    %c1_79 = arith.constant 1 : index
    %c0_80 = arith.constant 0 : index
    %c0_81 = arith.constant 0 : index
    %76 = vector.load %arg1[%c0_78, %c1_79, %c0_80, %c0_81] : memref<1x36x9x16xbf16, #tpu.memory_space<vmem>>, vector<1x8x8x16xbf16>
    %77 = vector.shape_cast %76 : vector<1x8x8x16xbf16> to vector<8x8x16xbf16>
    %78 = vector.shape_cast %77 : vector<8x8x16xbf16> to vector<64x16xbf16>
    %c0_82 = arith.constant 0 : index
    %c0_83 = arith.constant 0 : index
    %c0_84 = arith.constant 0 : index
    %79 = vector.load %arg3[%c0_82, %c0_83, %c0_84] : memref<1x64x128xf32, #tpu.memory_space<vmem>>, vector<1x64x128xf32>
    %80 = vector.shape_cast %79 : vector<1x64x128xf32> to vector<64x128xf32>
    %c6 = arith.constant 6 : index
    %c0_85 = arith.constant 0 : index
    %c0_86 = arith.constant 0 : index
    %81 = vector.load %arg2[%c6, %c0_85, %c0_86] : memref<9x16x128xbf16, #tpu.memory_space<vmem>>, vector<1x16x128xbf16>
    %82 = vector.shape_cast %81 : vector<1x16x128xbf16> to vector<16x128xbf16>
    %cst_87 = arith.constant dense<0.000000e+00> : vector<64x128xf32>
    %83 = tpu.matmul %78, %82, %cst_87 {dimension_numbers = #tpu.dot_dimension_numbers<[1], [0], [0], [1], [0, 0, 1, 1], [], []>} : vector<64x16xbf16>, vector<16x128xbf16>, vector<64x128xf32> -> vector<64x128xf32>
    %84 = arith.addf %80, %83 : vector<64x128xf32>
    %c0_88 = arith.constant 0 : index
    %c0_89 = arith.constant 0 : index
    %c0_90 = arith.constant 0 : index
    %85 = vector.load %arg3[%c0_88, %c0_89, %c0_90] : memref<1x64x128xf32, #tpu.memory_space<vmem>>, vector<1x64x128xf32>
    %86 = vector.shape_cast %85 : vector<1x64x128xf32> to vector<64x128xf32>
    %87 = vector.shape_cast %84 : vector<64x128xf32> to vector<1x64x128xf32>
    tpu.vector_store %arg3[%c0_88, %c0_89, %c0_90], %87 {strides = array<i32>} : memref<1x64x128xf32, #tpu.memory_space<vmem>>, vector<1x64x128xf32>,
    %c0_91 = arith.constant 0 : index
    %c10 = arith.constant 10 : index
    %c0_92 = arith.constant 0 : index
    %c0_93 = arith.constant 0 : index
    %88 = vector.load %arg1[%c0_91, %c10, %c0_92, %c0_93] : memref<1x36x9x16xbf16, #tpu.memory_space<vmem>>, vector<1x8x8x16xbf16>
    %89 = vector.shape_cast %88 : vector<1x8x8x16xbf16> to vector<8x8x16xbf16>
    %90 = vector.shape_cast %89 : vector<8x8x16xbf16> to vector<64x16xbf16>
    %c0_94 = arith.constant 0 : index
    %c0_95 = arith.constant 0 : index
    %c0_96 = arith.constant 0 : index
    %91 = vector.load %arg3[%c0_94, %c0_95, %c0_96] : memref<1x64x128xf32, #tpu.memory_space<vmem>>, vector<1x64x128xf32>
    %92 = vector.shape_cast %91 : vector<1x64x128xf32> to vector<64x128xf32>
    %c7 = arith.constant 7 : index
    %c0_97 = arith.constant 0 : index
    %c0_98 = arith.constant 0 : index
    %93 = vector.load %arg2[%c7, %c0_97, %c0_98] : memref<9x16x128xbf16, #tpu.memory_space<vmem>>, vector<1x16x128xbf16>
    %94 = vector.shape_cast %93 : vector<1x16x128xbf16> to vector<16x128xbf16>
    %cst_99 = arith.constant dense<0.000000e+00> : vector<64x128xf32>
    %95 = tpu.matmul %90, %94, %cst_99 {dimension_numbers = #tpu.dot_dimension_numbers<[1], [0], [0], [1], [0, 0, 1, 1], [], []>} : vector<64x16xbf16>, vector<16x128xbf16>, vector<64x128xf32> -> vector<64x128xf32>
    %96 = arith.addf %92, %95 : vector<64x128xf32>
    %c0_100 = arith.constant 0 : index
    %c0_101 = arith.constant 0 : index
    %c0_102 = arith.constant 0 : index
    %97 = vector.load %arg3[%c0_100, %c0_101, %c0_102] : memref<1x64x128xf32, #tpu.memory_space<vmem>>, vector<1x64x128xf32>
    %98 = vector.shape_cast %97 : vector<1x64x128xf32> to vector<64x128xf32>
    %99 = vector.shape_cast %96 : vector<64x128xf32> to vector<1x64x128xf32>
    tpu.vector_store %arg3[%c0_100, %c0_101, %c0_102], %99 {strides = array<i32>} : memref<1x64x128xf32, #tpu.memory_space<vmem>>, vector<1x64x128xf32>,
    %c0_103 = arith.constant 0 : index
    %c1_104 = arith.constant 1 : index
    %c1_105 = arith.constant 1 : index
    %c0_106 = arith.constant 0 : index
    %100 = vector.load %arg1[%c0_103, %c1_104, %c1_105, %c0_106] : memref<1x36x9x16xbf16, #tpu.memory_space<vmem>>, vector<1x8x8x16xbf16>
    %101 = vector.shape_cast %100 : vector<1x8x8x16xbf16> to vector<8x8x16xbf16>
    %102 = vector.shape_cast %101 : vector<8x8x16xbf16> to vector<64x16xbf16>
    %c0_107 = arith.constant 0 : index
    %c0_108 = arith.constant 0 : index
    %c0_109 = arith.constant 0 : index
    %103 = vector.load %arg3[%c0_107, %c0_108, %c0_109] : memref<1x64x128xf32, #tpu.memory_space<vmem>>, vector<1x64x128xf32>
    %104 = vector.shape_cast %103 : vector<1x64x128xf32> to vector<64x128xf32>
    %c8 = arith.constant 8 : index
    %c0_110 = arith.constant 0 : index
    %c0_111 = arith.constant 0 : index
    %105 = vector.load %arg2[%c8, %c0_110, %c0_111] : memref<9x16x128xbf16, #tpu.memory_space<vmem>>, vector<1x16x128xbf16>
    %106 = vector.shape_cast %105 : vector<1x16x128xbf16> to vector<16x128xbf16>
    %cst_112 = arith.constant dense<0.000000e+00> : vector<64x128xf32>
    %107 = tpu.matmul %102, %106, %cst_112 {dimension_numbers = #tpu.dot_dimension_numbers<[1], [0], [0], [1], [0, 0, 1, 1], [], []>} : vector<64x16xbf16>, vector<16x128xbf16>, vector<64x128xf32> -> vector<64x128xf32>
    %108 = arith.addf %104, %107 : vector<64x128xf32>
    %c0_113 = arith.constant 0 : index
    %c0_114 = arith.constant 0 : index
    %c0_115 = arith.constant 0 : index
    %109 = vector.load %arg3[%c0_113, %c0_114, %c0_115] : memref<1x64x128xf32, #tpu.memory_space<vmem>>, vector<1x64x128xf32>
    %110 = vector.shape_cast %109 : vector<1x64x128xf32> to vector<64x128xf32>
    %111 = vector.shape_cast %108 : vector<64x128xf32> to vector<1x64x128xf32>
    tpu.vector_store %arg3[%c0_113, %c0_114, %c0_115], %111 {strides = array<i32>} : memref<1x64x128xf32, #tpu.memory_space<vmem>>, vector<1x64x128xf32>,
    %c0_116 = arith.constant 0 : index
    %c0_117 = arith.constant 0 : index
    %c0_118 = arith.constant 0 : index
    %112 = vector.load %arg3[%c0_116, %c0_117, %c0_118] : memref<1x64x128xf32, #tpu.memory_space<vmem>>, vector<1x64x128xf32>
    %113 = vector.shape_cast %112 : vector<1x64x128xf32> to vector<64x128xf32>
    %cst_119 = arith.constant dense<0.000000e+00> : vector<128xf32>
    %114 = vector.multi_reduction <add>, %113, %cst_119 [0] : vector<64x128xf32> to vector<128xf32>
    %115 = vector.shape_cast %114 : vector<128xf32> to vector<1x128xf32>
    %c0_120 = arith.constant 0 : index
    %c0_121 = arith.constant 0 : index
    %c0_122 = arith.constant 0 : index
    %116 = vector.load %arg4[%c0_120, %c0_121, %c0_122] : memref<1x2x128xf32, #tpu.memory_space<vmem>>, vector<1x1x128xf32>
    %117 = vector.shape_cast %116 : vector<1x1x128xf32> to vector<1x128xf32>
    %118 = vector.shape_cast %115 : vector<1x128xf32> to vector<1x1x128xf32>
    tpu.vector_store %arg4[%c0_120, %c0_121, %c0_122], %118 {strides = array<i32>} : memref<1x2x128xf32, #tpu.memory_space<vmem>>, vector<1x1x128xf32>,
    %119 = arith.mulf %113, %113 : vector<64x128xf32>
    %cst_123 = arith.constant dense<0.000000e+00> : vector<128xf32>
    %120 = vector.multi_reduction <add>, %119, %cst_123 [0] : vector<64x128xf32> to vector<128xf32>
    %121 = vector.shape_cast %120 : vector<128xf32> to vector<1x128xf32>
    %c0_124 = arith.constant 0 : index
    %c1_125 = arith.constant 1 : index
    %c0_126 = arith.constant 0 : index
    %122 = vector.load %arg4[%c0_124, %c1_125, %c0_126] : memref<1x2x128xf32, #tpu.memory_space<vmem>>, vector<1x1x128xf32>
    %123 = vector.shape_cast %122 : vector<1x1x128xf32> to vector<1x128xf32>
    %124 = vector.shape_cast %121 : vector<1x128xf32> to vector<1x1x128xf32>
    tpu.vector_store %arg4[%c0_124, %c1_125, %c0_126], %124 {strides = array<i32>} : memref<1x2x128xf32, #tpu.memory_space<vmem>>, vector<1x1x128xf32>,
    return
  }
  func.func @transform_0(%arg0: i32) -> (i32, i32, i32, i32) {
    %c0_i32 = arith.constant 0 : i32
    %c0_i32_0 = arith.constant 0 : i32
    %c0_i32_1 = arith.constant 0 : i32
    %c0_i32_2 = arith.constant 0 : i32
    return %arg0, %c0_i32, %c0_i32_0, %c0_i32_1 : i32, i32, i32, i32
  }
  func.func @transform_1(%arg0: i32) -> (i32, i32, i32) {
    %c0_i32 = arith.constant 0 : i32
    %c0_i32_0 = arith.constant 0 : i32
    %c0_i32_1 = arith.constant 0 : i32
    %c0_i32_2 = arith.constant 0 : i32
    return %c0_i32, %c0_i32_0, %c0_i32_1 : i32, i32, i32
  }
  func.func @transform_2(%arg0: i32) -> (i32, i32, i32) {
    %c0_i32 = arith.constant 0 : i32
    %c0_i32_0 = arith.constant 0 : i32
    %c0_i32_1 = arith.constant 0 : i32
    return %arg0, %c0_i32, %c0_i32_0 : i32, i32, i32
  }
  func.func @transform_3(%arg0: i32) -> (i32, i32, i32) {
    %c0_i32 = arith.constant 0 : i32
    %c0_i32_0 = arith.constant 0 : i32
    %c0_i32_1 = arith.constant 0 : i32
    return %arg0, %c0_i32, %c0_i32_0 : i32, i32, i32
  }
}

</mosaic_0001>

<bundles_post_ra>
// kernel: tpu_custom_call.1
= control target key start
LH: loop header
LB: loop body
LE: loop exit
PB: predicated region body
PF: predicated region fallthrough
CT: control target
= control target key end

     0   :  { %9 = vsyncpa [#allocation3], 0  ;;  %s2944_s0 = inlined_call_operand.vmem [shape: bf16[2,36,9,16], index: 0, kind: input, shape index: {}]   ;;  %s2945_s1 = inlined_call_operand.vmem [shape: bf16[9,16,128], index: 1, kind: input, shape index: {}]   ;;  %s2946_s2 = inlined_call_operand.hbm [shape: f32[2,64,128], index: 2, kind: output, shape index: {0}]   ;;  %s2947_s3 = inlined_call_operand.hbm [shape: f32[2,2,128], index: 3, kind: output, shape index: {1}]  }
   0x1   :  { %11 = vsyncpa [#allocation3 + $0x1], 0 }
   0x2   :  { %12 = vsyncpa [#allocation5], 0 }
   0x3   :  { %14 = vsyncpa [#allocation5 + $0x1], 0  ;;  %s2571_s12 = smov 0   ;;  %s2573_s13 = smov 0  }
   0x4   :  { %s2575_s14 = smov 0   ;;  %s2577_s15 = smov 0  }
   0x5 LB: > { %s2592_s16 = sadd.s32 4294967295, %s2545_s15   ;;  %s1945_s17 = sadd.s32 4294967294, %s2545_s15   ;;  %s2545_s15 = sphi %s2577_s15, %s2955_s15   ;;  %s2541_s14 = sphi %s2575_s14, %s2954_s14   ;;  %s2537_s13 = sphi %s2573_s13, %s2953_s13   ;;  %s2533_s12 = sphi %s2571_s12, %s2952_s12  }
   0x6   : > { %s2596_s18 = sadd.s32 1, %s2545_s15   ;;  %s74_s19 = sadd.s32 1, %s2541_s14 }
   0x7   : > { %s71_s20 = ssub.s32 %s2545_s15, %s2596_s18  ;;  %p84_p0 = scmp.ne.s32.totalorder %s2541_s14, %s2537_s13 }
   0x8   : > { %p72_p1 = scmp.eq.s32.totalorder %s71_s20, 0  ;;  %p85_p2 = scmp.eq.s32.totalorder %s2592_s16, 1 }
   0x9   : > { %p90_p3 = scmp.ne.s32.totalorder %s2537_s13, %s2533_s12  ;;  %p91_p4 = scmp.eq.s32.totalorder %s1945_s17, 1 }
   0xa   : > { %s2607_s21 = scalar_select %p72_p1, %s2541_s14, %s74_s19  }
   0xb   : > { %p2609_p5 = por %p85_p2, %p84_p0  ;;  %p2613_p6 = por %p91_p4, %p90_p3 }
   0xc   : > { %p1948_p7 = scmp.ge.s32.totalorder %s2545_s15, 1  ;;  %p146_p8 = scmp.lt.s32.totalorder %s2545_s15, 3 }
   0xe   : > { %p147_p9 = pnand %p1948_p7, %p146_p8 }
   0xf   : > { %v2418_v0 = vld [vmem:[%s2945_s1] sm:$0xff] (!%p147_p9)   ;;  %p175_p10 = scmp.lt.s32.totalorder (!%p147_p9), %s2592_s16, 1  ;;  %v2421_v2 = vld [vmem:[%s2945_s1 + $0x8] sm:$0xff] (!%p147_p9)   ;;  %vm233_vm0 = vcmask (!%p147_p9), 130048   ;;  %vm482_vm1 = vsmask.f32 (!%p147_p9), 3328 }
  0x10   : > { %150 = sbr.rel (%p147_p9) target bundleno = 375 (0x177), region = 28  ;;  %v2626_v1 = vld [vmem:[%s2945_s1 + $0x20] sm:$0xff] (!%p147_p9)   ;;  %2174 = vmatprep.subr.bf16.mxu1 (!%p147_p9), %v2418_v0  ;;  %v2427_v3 = vld [vmem:[%s2945_s1 + $0x28] sm:$0xff] (!%p147_p9)   ;;  %v2647_v6 = vld [vmem:[%s2945_s1 + $0x10] sm:$0xff] (!%p147_p9)   ;;  %vm483_vm2 = vsmask.f32 (!%p147_p9), 7440 }
  0x11   : > { %2175 = vmatpush3.bf16.msra.mxu1 (!%p147_p9), %v2418_v0  ;;  %2214 = vmatprep.subr.bf16.mxu0 (!%p147_p9), %v2626_v1  ;;  %v2652_v7 = vld [vmem:[%s2945_s1 + $0x30] sm:$0xff] (!%p147_p9)   ;;  %vm2676_vm3 = vmor (!%p147_p9), %vm482_vm1, %vm483_vm2  ;;  %s2842_s29 = sand.u32 (!%p147_p9), 1, %s2537_s13   ;;  %s2128_s5 = sshll.u32 (!%p147_p9), %s2592_s16, 10 }
  0x12   : > { %2215 = vmatpush3.bf16.msra.mxu0 (!%p147_p9), %v2626_v1  ;;  %2184 = vmatprep.subr.bf16.mxu1 (!%p147_p9), %v2421_v2  ;;  %s1949_s30 = sshll.u32 (!%p147_p9), %s2842_s29, 6  ;;  %s1820_s10 = scalar_lea.sflag (!%p147_p9), [#allocation3], %s2842_s29 }
  0x13   : > { %2224 = vmatprep.subr.bf16.mxu0 (!%p147_p9), %v2427_v3  ;;  %s2845_s4 = scalar_lea.vmem (!%p147_p9), [#allocation2], %s1949_s30  ;;  %s2547_s17 = smov (!%p147_p9), [#allocation2]  }
  0x14   : > { %s2455_s19 = sshll.u32 (!%p147_p9), %s2547_s17, 4  ;;  %s2456_s19 = int_to_ptr.vmem [resolvable:$false] %s2455_s19 }
  0x15   : > { %s2457_s20 = scalar_lea.vmem (!%p147_p9), %s2456_s19, 2048 }
  0x17   : > { %s176_s28 = scalar_select %p175_p10, %s2592_s16, 1 }
  0x19   : > { %s2370_s6 = smul.u32 288, %s176_s28 }
  0x1b   : > { %s2640_s9 = scalar_lea.vmem %s2944_s0, %s2370_s6  ;;  %s1838_s6 = sshll.u32 %s2845_s4, 4  ;;  %s2861_s6 = int_to_ptr.vmem [resolvable:$true] %s1838_s6 }
  0x1c   : > { %v2420_v4 = vld [vmem:[%s2640_s9] ss:$8 sps:$4 sm:$0xff]   ;;  %v2423_v8 = vld [vmem:[%s2640_s9 + $0x10] ss:$8 sps:$4 sm:$0xff]   ;;  %v2030_v13 = vld [vmem:[%s2640_s9 + $0x94] sm:$0x1]  ;;  %p2458_p0 = scmp.lt.s32.totalorder %s2861_s6, %s2456_s19 }
  0x1d   : > { %v2422_v5 = vld [vmem:[%s2640_s9 + $0xd8] ss:$8 sps:$4 sm:$0xff]   ;;  %2176 = vmatprep.mubr.msk.bf16.mxu1 %vm233_vm0, %v2420_v4  ;;  %v2424_v9 = vld [vmem:[%s2640_s9 + $0xe8] ss:$8 sps:$4 sm:$0xff]   ;;  %v2032_v15 = vld [vmem:[%s2640_s9 + $0x9c] sm:$0x1] }
  0x1e   : > { %2216 = vmatprep.mubr.msk.bf16.mxu0 %vm233_vm0, %v2422_v5  ;;  %2177 = vmatmul.mubr.msk.bf16.vlgmr.msra.gmra.mrb[0].mxu1 %vm233_vm0, %v2423_v8  ;;  %v2425_v10 = vld [vmem:[%s2640_s9 + $0x20] ss:$8 sps:$4 sm:$0xff]   ;;  %v2426_v11 = vld [vmem:[%s2640_s9 + $0x30] ss:$8 sps:$4 sm:$0xff]   ;;  %v1023_v18 = vshll.u32 %v2030_v13, 16  ;;  %v1037_v21 = vshll.u32 %v2032_v15, 16 }
  0x1f   : > { %2185 = vmatpush3.bf16.msra.mxu1 %v2421_v2  ;;  %2217 = vmatmul.mubr.msk.bf16.vlgmr.msra.gmra.mrb[0].mxu0 %vm233_vm0, %v2424_v9  ;;  %v2029_v12 = vld [vmem:[%s2640_s9 + $0x90] sm:$0xf]  ;;  %v2031_v14 = vld [vmem:[%s2640_s9 + $0x98] sm:$0xf]  ;;  %v2033_v22 = vld [vmem:[%s2640_s9 + $0xa0] sm:$0xf] }
  0x20   : > { %2180 = vmatprep.mubr.msk.bf16.mxu1 %vm233_vm0, %v2425_v10  ;;  %2225 = vmatpush3.bf16.msra.mxu0 %v2427_v3  ;;  %v1014_v16 = vshrl.u32 %v2029_v12, 16  ;;  %v1017_v17 = vshll.u32 %v2029_v12, 16  ;;  %v1028_v19 = vshrl.u32 %v2031_v14, 16  ;;  %v1031_v20 = vshll.u32 %v2031_v14, 16  ;;  %v2034_v23 = vld [vmem:[%s2640_s9 + $0xa4] sm:$0x1] }
  0x21   : > { %2194 = vmatprep.subr.bf16.mxu1 %v2647_v6  ;;  %2234 = vmatprep.subr.bf16.mxu0 %v2652_v7  ;;  %v1025_v26 = vrot.slane %v1023_v18, 5  ;;  %v2035_v28 = vld [vmem:[%s2640_s9 + $0xa8] sm:$0xf]  ;;  %v1039_v30 = vrot.slane %v1037_v21, 5  ;;  %v2036_v31 = vld [vmem:[%s2640_s9 + $0xac] sm:$0x1] }
  0x22   : > { %v1016_v24 = vrot.slane %v1014_v16, 4  ;;  %v1019_v25 = vrot.slane %v1017_v17, 5  ;;  %v1030_v27 = vrot.slane %v1028_v19, 4  ;;  %v1033_v29 = vrot.slane %v1031_v20, 5  ;;  %v2428_v47 = vld [vmem:[%s2640_s9 + $0x48] ss:$8 sps:$4 sm:$0xff]  }
  0x23   : > { %v1042_v32 = vshrl.u32 %v2033_v22, 16  ;;  %v1045_v33 = vshll.u32 %v2033_v22, 16  ;;  %v1051_v35 = vshll.u32 %v2034_v23, 16  ;;  %v1056_v36 = vshrl.u32 %v2035_v28, 16  ;;  %v2430_v53 = vld [vmem:[%s2640_s9 + $0x58] ss:$8 sps:$4 sm:$0xff]  }
  0x24   : > { %v1020_v34 = vor.u32 %v1019_v25, %v1016_v24  ;;  %v1059_v37 = vshll.u32 %v2035_v28, 16  ;;  %v1034_v39 = vor.u32 %v1033_v29, %v1030_v27  ;;  %v1065_v42 = vshll.u32 %v2036_v31, 16  ;;  %v2037_v54 = vld [vmem:[%s2640_s9 + $0xb0] sm:$0xf]  ;;  %v2038_v55 = vld [vmem:[%s2640_s9 + $0xb4] sm:$0x1] }
  0x25   : > { %v1044_v40 = vrot.slane %v1042_v32, 4  ;;  %v1047_v41 = vrot.slane %v1045_v33, 5  ;;  %v1053_v44 = vrot.slane %v1051_v35, 5  ;;  %v1058_v45 = vrot.slane %v1056_v36, 4  ;;  %v2039_v58 = vld [vmem:[%s2640_s9 + $0xb8] sm:$0xf] }
  0x26   : > { %2181 = vmatmul.mubr.msk.bf16.gmra.mrb[4].mxu1 %vm233_vm0, %v2426_v11  ;;  %v1021_v43 = vrot.slane %v1020_v34, 4  ;;  %v1061_v46 = vrot.slane %v1059_v37, 5  ;;  %v1035_v48 = vrot.slane %v1034_v39, 4  ;;  %v1067_v50 = vrot.slane %v1065_v42, 5  ;;  %v2040_v59 = vld [vmem:[%s2640_s9 + $0xbc] sm:$0x1] }
  0x27   : > { %v1048_v49 = vor.u32 %v1047_v41, %v1044_v40  ;;  %2186 = vmatprep.mubr.msk.bf16.mxu1 %vm233_vm0, %v2428_v47  ;;  %v1070_v60 = vshrl.u32 %v2037_v54, 16  ;;  %v1073_v63 = vshll.u32 %v2037_v54, 16  ;;  %v1079_v0 = vshll.u32 %v2038_v55, 16  ;;  %v2041_v2 = vld [vmem:[%s2640_s9 + $0xc0] sm:$0xf]  ;;  %v2698_v10 = vld [vmem:[%s2945_s1 + $0x18] sm:$0xff]  }
  0x28   : > { %v1026_v51 = vsel %vm2676_vm3, %v1021_v43, %v1025_v26  ;;  %v1062_v52 = vor.u32 %v1061_v46, %v1058_v45  ;;  %v1040_v56 = vsel %vm2676_vm3, %v1035_v48, %v1039_v30  ;;  %v1084_v5 = vshrl.u32 %v2039_v58, 16  ;;  %v2042_v9 = vld [vmem:[%s2640_s9 + $0xc4] sm:$0x1]  ;;  %v2043_v15 = vld [vmem:[%s2640_s9 + $0xc8] sm:$0xf]  ;;  %v2709_v21 = vld [vmem:[%s2945_s1 + $0x38] sm:$0xff]  }
  0x29   : > { %v1049_v57 = vrot.slane %v1048_v49, 4  ;;  %v2047_v61 = vcombine.low %v1026_v51, %v1040_v56  ;;  %v1072_v4 = vrot.slane %v1070_v60, 4  ;;  %v1087_v8 = vshll.u32 %v2039_v58, 16  ;;  %v2044_v19 = vld [vmem:[%s2640_s9 + $0xcc] sm:$0x1]  ;;  %s2451_s11 = scalar_lea.vmem %s2861_s6, 1024 }
  0x2a   : > { %v1063_v62 = vrot.slane %v1062_v52, 4  ;;  %v1075_v12 = vrot.slane %v1073_v63, 5  ;;  %v1081_v13 = vrot.slane %v1079_v0, 5  ;;  %v1093_v14 = vshll.u32 %v2040_v59, 16  ;;  %v2432_v33 = vld [vmem:[%s2640_s9 + $0x68] ss:$8 sps:$4 sm:$0xff]   ;;  %p2452_p11 = scmp.ne.s32.totalorder %s2861_s6, %s2451_s11  ;;  %p2459_p1 = scmp.lt.s32.totalorder %s2457_s20, %s2451_s11 }
  0x2b   : > { %v1054_v3 = vsel %vm2676_vm3, %v1049_v57, %v1053_v44  ;;  %2226 = vmatprep.mubr.msk.bf16.mxu0 %vm233_vm0, %v2047_v61  ;;  %v1086_v17 = vrot.slane %v1084_v5, 4  ;;  %v1089_v18 = vrot.slane %v1087_v8, 5  ;;  %v1098_v20 = vshrl.u32 %v2041_v2, 16  ;;  %v2433_v40 = vld [vmem:[%s2640_s9 + $0x78] ss:$8 sps:$4 sm:$0xff]  }
  0x2c   : > { %v1068_v11 = vsel %vm2676_vm3, %v1063_v62, %v1067_v50  ;;  %v1076_v22 = vor.u32 %v1075_v12, %v1072_v4  ;;  %v1095_v23 = vrot.slane %v1093_v14, 5  ;;  %v1101_v24 = vshll.u32 %v2041_v2, 16  ;;  %v2434_v46 = vld [vmem:[%s2640_s9 + $0x8] ss:$8 sps:$4 sm:$0xff]   ;;  %v466_v47 = vld [vmem:[%s2640_s9] sm:$0xf]  ;;  %p2453_p12 = pnand %p2452_p11, %p2609_p5  ;;  %p2460_p2 = por %p2459_p1, %p2458_p0 }
  0x2d   : > { %v2048_v16 = vcombine.low %v1054_v3, %v1068_v11  ;;  %v1107_v25 = vshll.u32 %v2042_v9, 16  ;;  %v1090_v26 = vor.u32 %v1089_v18, %v1086_v17  ;;  %v1100_v27 = vrot.slane %v1098_v20, 4  ;;  %v467_v49 = vld [vmem:[%s2640_s9 + $0x4] sm:$0x1]  ;;  %v468_v50 = vld [vmem:[%s2640_s9 + $0x8] sm:$0xf] }
  0x2e   : > { %2187 = vmatmul.mubr.msk.bf16.vlgmr.msra.gmra.mrb[0].mxu1 %vm233_vm0, %v2430_v53  ;;  %v1112_v28 = vshrl.u32 %v2043_v15, 16  ;;  %v1115_v29 = vshll.u32 %v2043_v15, 16  ;;  %v1077_v30 = vrot.slane %v1076_v22, 4  ;;  %v1103_v31 = vrot.slane %v1101_v24, 5  ;;  %v469_v51 = vld [vmem:[%s2640_s9 + $0xc] sm:$0x1]  ;;  %p2454_p13 = pneg %p2453_p12 }
  0x2f   : > { %2195 = vmatpush3.bf16.msra.mxu1 %v2647_v6  ;;  %2227 = vmatmul.mubr.msk.bf16.vlgmr.msra.gmra.mrb[0].mxu0 %vm233_vm0, %v2048_v16  ;;  %v1121_v32 = vshll.u32 %v2044_v19, 16  ;;  %v1091_v6 = vrot.slane %v1090_v26, 4  ;;  %v1109_v39 = vrot.slane %v1107_v25, 5  ;;  %v486_v53 = vshrl.u32 %v466_v47, 16  ;;  %v470_v63 = vld [vmem:[%s2640_s9 + $0x10] sm:$0xf] }
  0x30   : > { %2204 = vmatprep.subr.bf16.mxu1 %v2698_v10  ;;  %2235 = vmatpush3.bf16.msra.mxu0 %v2652_v7  ;;  %v1114_v34 = vrot.slane %v1112_v28, 4  ;;  %v1117_v35 = vrot.slane %v1115_v29, 5  ;;  %v1082_v36 = vsel %vm2676_vm3, %v1077_v30, %v1081_v13  ;;  %v1104_v37 = vor.u32 %v1103_v31, %v1100_v27  ;;  %v471_v4 = vld [vmem:[%s2640_s9 + $0x14] sm:$0x1]  ;;  %v472_v9 = vld [vmem:[%s2640_s9 + $0x18] sm:$0xf]  ;;  %p2461_p3 = pnand %p2460_p2, %p2454_p13 }
  0x31   : > { %2244 = vmatprep.subr.bf16.mxu0 %v2709_v21  ;;  %2190 = vmatprep.mubr.msk.bf16.mxu1 %vm233_vm0, %v2432_v33  ;;  %v1096_v7 = vsel %vm2676_vm3, %v1091_v6, %v1095_v23  ;;  %v1123_v42 = vrot.slane %v1121_v32, 5  ;;  %v489_v54 = vshll.u32 %v466_v47, 16  ;;  %v495_v55 = vshll.u32 %v467_v49, 16  ;;  %v473_v11 = vld [vmem:[%s2640_s9 + $0x1c] sm:$0x1] }
  0x32   : > { %v1118_v41 = vor.u32 %v1117_v35, %v1114_v34  ;;  %v2049_v43 = vcombine.low %v1082_v36, %v1096_v7  ;;  %v1105_v44 = vrot.slane %v1104_v37, 4  ;;  %v500_v57 = vshrl.u32 %v468_v50, 16  ;;  %v2435_v22 = vld [vmem:[%s2640_s9 + $0x18] ss:$8 sps:$4 sm:$0xff]   ;;  %v2437_v29 = vld [vmem:[%s2640_s9 + $0x28] ss:$8 sps:$4 sm:$0xff]  }
  0x33   : > { %v503_v58 = vshll.u32 %v468_v50, 16  ;;  %v509_v59 = vshll.u32 %v469_v51, 16  ;;  %v488_v60 = vrot.slane %v486_v53, 4  ;;  %v491_v61 = vrot.slane %v489_v54, 5  ;;  %v474_v34 = vld [vmem:[%s2640_s9 + $0x20] sm:$0xf] }
  0x34   : > { %v1119_v45 = vrot.slane %v1118_v41, 4  ;;  %2230 = vmatprep.mubr.msk.bf16.mxu0 %vm233_vm0, %v2049_v43  ;;  %v1110_v48 = vsel %vm2676_vm3, %v1105_v44, %v1109_v39  ;;  %v497_v62 = vrot.slane %v495_v55, 5  ;;  %v502_v0 = vrot.slane %v500_v57, 4  ;;  %v475_v35 = vld [vmem:[%s2640_s9 + $0x24] sm:$0x1] }
  0x35   : > { %v505_v2 = vrot.slane %v503_v58, 5  ;;  %v511_v3 = vrot.slane %v509_v59, 5  ;;  %v514_v5 = vshrl.u32 %v470_v63, 16  ;;  %v492_v8 = vor.u32 %v491_v61, %v488_v60  ;;  %v2751_v36 = vld [vmem:[%s2945_s1 + $0x40] sm:$0xff]   ;;  %v476_v39 = vld [vmem:[%s2640_s9 + $0x28] sm:$0xf] }
  0x36   : > { %2191 = vmatmul.mubr.msk.bf16.gmra.mrb[4].mxu1 %vm233_vm0, %v2433_v40  ;;  %v1124_v52 = vsel %vm2676_vm3, %v1119_v45, %v1123_v42  ;;  %v517_v12 = vshll.u32 %v470_v63, 16  ;;  %v523_v13 = vshll.u32 %v471_v4, 16  ;;  %v528_v16 = vshrl.u32 %v472_v9, 16  ;;  %v477_v40 = vld [vmem:[%s2640_s9 + $0x2c] sm:$0x1] }
  0x37   : > { %v2050_v56 = vcombine.low %v1110_v48, %v1124_v52  ;;  %v506_v14 = vor.u32 %v505_v2, %v502_v0  ;;  %v516_v15 = vrot.slane %v514_v5, 4  ;;  %v531_v17 = vshll.u32 %v472_v9, 16  ;;  %v478_v45 = vld [vmem:[%s2640_s9 + $0x30] sm:$0xf]  ;;  %v2438_v47 = vld [vmem:[%s2640_s9 + $0x38] ss:$8 sps:$4 sm:$0xff]  }
  0x38   : > { %v493_v18 = vrot.slane %v492_v8, 4  ;;  %v519_v19 = vrot.slane %v517_v12, 5  ;;  %v537_v20 = vshll.u32 %v473_v11, 16  ;;  %v525_v24 = vrot.slane %v523_v13, 5  ;;  %v479_v51 = vld [vmem:[%s2640_s9 + $0x34] sm:$0x1] }
  0x39   : > { %2231 = vmatmul.mubr.msk.bf16.gmra.mrb[4].mxu0 %vm233_vm0, %v2050_v56  ;;  %v507_v23 = vrot.slane %v506_v14, 4  ;;  %v530_v25 = vrot.slane %v528_v16, 4  ;;  %v533_v26 = vrot.slane %v531_v17, 5  ;;  %v542_v7 = vshrl.u32 %v474_v34, 16  ;;  %v480_v56 = vld [vmem:[%s2640_s9 + $0x38] sm:$0xf] }
  0x3a   : > { %2236 = vmatprep.mubr.msk.bf16.mxu0 %vm233_vm0, %v2434_v46  ;;  %v498_v27 = vsel %vm2676_vm3, %v493_v18, %v497_v62  ;;  %v520_v28 = vor.u32 %v519_v19, %v516_v15  ;;  %v539_v32 = vrot.slane %v537_v20, 5  ;;  %v545_v42 = vshll.u32 %v474_v34, 16  ;;  %v481_v59 = vld [vmem:[%s2640_s9 + $0x3c] sm:$0x1]  ;;  %v2440_v12 = vld [vmem:[%s2640_s9 + $0x50] ss:$8 sps:$4 sm:$0xff]  }
  0x3b   : > { %v512_v30 = vsel %vm2676_vm3, %v507_v23, %v511_v3  ;;  %v534_v31 = vor.u32 %v533_v26, %v530_v25  ;;  %v551_v43 = vshll.u32 %v475_v35, 16  ;;  %v556_v44 = vshrl.u32 %v476_v39, 16  ;;  %v2441_v23 = vld [vmem:[%s2640_s9 + $0x60] ss:$8 sps:$4 sm:$0xff]   ;;  %v2442_v25 = vld [vmem:[%s2640_s9 + $0x90] ss:$8 sps:$4 sm:$0xff]  }
  0x3c   : > { %v1982_v33 = vcombine.low %v498_v27, %v512_v30  ;;  %v521_v6 = vrot.slane %v520_v28, 4  ;;  %v544_v48 = vrot.slane %v542_v7, 4  ;;  %v559_v49 = vshll.u32 %v476_v39, 16  ;;  %v2444_v27 = vld [vmem:[%s2640_s9 + $0x70] ss:$8 sps:$4 sm:$0xff]  }
  0x3d   : > { %v535_v37 = vrot.slane %v534_v31, 4  ;;  %v565_v50 = vshll.u32 %v477_v40, 16  ;;  %v547_v53 = vrot.slane %v545_v42, 5  ;;  %v553_v54 = vrot.slane %v551_v43, 5  ;;  %v2095_v30 = vld [vmem:[%s2640_s9 + $0xc] sm:$0x1] }
  0x3e   : > { %2196 = vmatprep.mubr.msk.bf16.mxu1 %vm233_vm0, %v1982_v33  ;;  %v526_v41 = vsel %vm2676_vm3, %v521_v6, %v525_v24  ;;  %v558_v55 = vrot.slane %v556_v44, 4  ;;  %v561_v57 = vrot.slane %v559_v49, 5  ;;  %v570_v60 = vshrl.u32 %v478_v45, 16  ;;  %v2096_v31 = vld [vmem:[%s2640_s9 + $0x10] sm:$0xf] }
  0x3f   : > { %v540_v46 = vsel %vm2676_vm3, %v535_v37, %v539_v32  ;;  %v567_v58 = vrot.slane %v565_v50, 5  ;;  %v573_v61 = vshll.u32 %v478_v45, 16  ;;  %v579_v62 = vshll.u32 %v479_v51, 16  ;;  %v2097_v32 = vld [vmem:[%s2640_s9 + $0x14] sm:$0x1] }
  0x40   : > { %v1983_v52 = vcombine.low %v526_v41, %v540_v46  ;;  %v584_v63 = vshrl.u32 %v480_v56, 16  ;;  %v587_v0 = vshll.u32 %v480_v56, 16  ;;  %v562_v2 = vor.u32 %v561_v57, %v558_v55  ;;  %v2443_v33 = vld [vmem:[%s2640_s9 + $0xa0] ss:$8 sps:$4 sm:$0xff]   ;;  %v2098_v40 = vld [vmem:[%s2640_s9 + $0x18] sm:$0xf] }
  0x41   : > { %2237 = vmatmul.mubr.msk.bf16.vlgmr.msra.gmra.mrb[0].mxu0 %vm233_vm0, %v2435_v22  ;;  %v572_v3 = vrot.slane %v570_v60, 4  ;;  %v575_v4 = vrot.slane %v573_v61, 5  ;;  %v593_v5 = vshll.u32 %v481_v59, 16  ;;  %v581_v15 = vrot.slane %v579_v62, 5  ;;  %v2445_v6 = vld [vmem:[%s2640_s9 + $0x80] ss:$8 sps:$4 sm:$0xff]  }
  0x42   : > { %2240 = vmatprep.mubr.msk.bf16.mxu0 %vm233_vm0, %v2437_v29  ;;  %2245 = vmatpush3.bf16.msra.mxu0 %v2709_v21  ;;  %v548_v21 = vor.u32 %v547_v53, %v544_v48  ;;  %v586_v9 = vrot.slane %v584_v63, 4  ;;  %v589_v11 = vrot.slane %v587_v0, 5  ;;  %v563_v13 = vrot.slane %v562_v2, 4  ;;  %v2094_v29 = vld [vmem:[%s2640_s9 + $0x8] sm:$0xf] }
  0x43   : > { %2254 = vmatprep.subr.bf16.mxu0 %v2751_v36  ;;  %2197 = vmatmul.mubr.msk.bf16.vlgmr.msra.gmra.mrb[0].mxu1 %vm233_vm0, %v1983_v52  ;;  %v576_v14 = vor.u32 %v575_v4, %v572_v3  ;;  %v595_v17 = vrot.slane %v593_v5, 5  ;;  %v1542_v34 = vshrl.u32 %v2094_v29, 16  ;;  %v1545_v35 = vshll.u32 %v2094_v29, 16  ;;  %v2447_v7 = vld [vmem:[%s2640_s9 + $0xb0] ss:$8 sps:$4 sm:$0xff]  }
  0x44   : > { %2205 = vmatpush3.bf16.msra.mxu1 %v2698_v10  ;;  %v549_v8 = vrot.slane %v548_v21, 4  ;;  %v590_v16 = vor.u32 %v589_v11, %v586_v9  ;;  %v568_v18 = vsel %vm2676_vm3, %v563_v13, %v567_v58  ;;  %v1551_v37 = vshll.u32 %v2095_v30, 16  ;;  %v2099_v43 = vld [vmem:[%s2640_s9 + $0x1c] sm:$0x1]  ;;  %v2100_v44 = vld [vmem:[%s2640_s9 + $0x20] sm:$0xf] }
  0x45   : > { %2264 = vmatprep.subr.bf16.mxu1 %v2626_v1  ;;  %v577_v19 = vrot.slane %v576_v14, 4  ;;  %v1556_v39 = vshrl.u32 %v2096_v31, 16  ;;  %v1559_v41 = vshll.u32 %v2096_v31, 16  ;;  %v1565_v42 = vshll.u32 %v2097_v32, 16  ;;  %v2101_v49 = vld [vmem:[%s2640_s9 + $0x24] sm:$0x1] }
  0x46   : > { %v554_v10 = vsel %vm2676_vm3, %v549_v8, %v553_v54  ;;  %v591_v22 = vrot.slane %v590_v16, 4  ;;  %v1544_v45 = vrot.slane %v1542_v34, 4  ;;  %v1547_v46 = vrot.slane %v1545_v35, 5  ;;  %v2102_v0 = vld [vmem:[%s2640_s9 + $0x28] sm:$0xf] }
  0x47   : > { %v1984_v20 = vcombine.low %v554_v10, %v568_v18  ;;  %v582_v24 = vsel %vm2676_vm3, %v577_v19, %v581_v15  ;;  %v1558_v48 = vrot.slane %v1556_v39, 4  ;;  %v1561_v50 = vrot.slane %v1559_v41, 5  ;;  %v2103_v5 = vld [vmem:[%s2640_s9 + $0x2c] sm:$0x1]  ;;  %v2104_v8 = vld [vmem:[%s2640_s9 + $0x30] sm:$0xf] }
  0x48   : > { %v596_v26 = vsel %vm2676_vm3, %v591_v22, %v595_v17  ;;  %v1567_v51 = vrot.slane %v1565_v42, 5  ;;  %v1570_v52 = vshrl.u32 %v2098_v40, 16  ;;  %v1548_v53 = vor.u32 %v1547_v46, %v1544_v45  ;;  %v2448_v9 = vld [vmem:[%s2640_s9 + $0xc0] ss:$8 sps:$4 sm:$0xff]   ;;  %v2105_v13 = vld [vmem:[%s2640_s9 + $0x34] sm:$0x1] }
  0x49   : > { %2241 = vmatmul.mubr.msk.bf16.gmra.mrb[4].mxu0 %vm233_vm0, %v2438_v47  ;;  %2200 = vmatprep.mubr.msk.bf16.mxu1 %vm233_vm0, %v1984_v20  ;;  %v1985_v28 = vcombine.low %v582_v24, %v596_v26  ;;  %v1553_v47 = vrot.slane %v1551_v37, 5  ;;  %v1579_v54 = vshll.u32 %v2099_v43, 16  ;;  %v1584_v55 = vshrl.u32 %v2100_v44, 16  ;;  %v2449_v20 = vld [vmem:[%s2640_s9 + $0xf8] ss:$8 sps:$4 sm:$0xff]  }
  0x4a   : > { %2246 = vmatprep.mubr.msk.bf16.mxu0 %vm233_vm0, %v2440_v12  ;;  %v1587_v56 = vshll.u32 %v2100_v44, 16  ;;  %v1562_v57 = vor.u32 %v1561_v50, %v1558_v48  ;;  %v1572_v58 = vrot.slane %v1570_v52, 4  ;;  %v1593_v60 = vshll.u32 %v2101_v49, 16  ;;  %v2107_v32 = vld [vmem:[%s2640_s9 + $0x3c] sm:$0x1] }
  0x4b   : > { %2201 = vmatmul.mubr.msk.bf16.gmra.mrb[4].mxu1 %vm233_vm0, %v1985_v28  ;;  %v1549_v61 = vrot.slane %v1548_v53, 4  ;;  %v1581_v21 = vrot.slane %v1579_v54, 5  ;;  %v1586_v62 = vrot.slane %v1584_v55, 4  ;;  %v1598_v14 = vshrl.u32 %v2102_v0, 16  ;;  %v2106_v28 = vld [vmem:[%s2640_s9 + $0x38] sm:$0xf] }
  0x4c   : > { %2206 = vmatprep.mubr.msk.bf16.mxu1 %vm233_vm0, %v2442_v25  ;;  %v1589_v63 = vrot.slane %v1587_v56, 5  ;;  %v1563_v2 = vrot.slane %v1562_v57, 4  ;;  %v1595_v4 = vrot.slane %v1593_v60, 5  ;;  %v1601_v15 = vshll.u32 %v2102_v0, 16  ;;  %v2109_v37 = vld [vmem:[%s2640_s9 + $0x44] sm:$0x1] }
  0x4d   : > { %v1554_v11 = vsel %vm2676_vm3, %v1549_v61, %v1553_v47  ;;  %v1607_v16 = vshll.u32 %v2103_v5, 16  ;;  %v1612_v17 = vshrl.u32 %v2104_v8, 16  ;;  %v1600_v22 = vrot.slane %v1598_v14, 4  ;;  %v2450_v60 = vld [vmem:[%s2640_s9 + $0x108] ss:$8 sps:$4 sm:$0xff]  }
  0x4e   : > { %v1590_v12 = vor.u32 %v1589_v63, %v1586_v62  ;;  %v1621_v31 = vshll.u32 %v2105_v13, 16  ;;  %v1629_v39 = vshll.u32 %v2106_v28, 16  ;;  %v1649_v49 = vshll.u32 %v2109_v37, 16 }
  0x4f   : > { %v1609_v25 = vrot.slane %v1607_v16, 5  ;;  %v1614_v26 = vrot.slane %v1612_v17, 4 }
  0x50   : > { %v1591_v19 = vrot.slane %v1590_v12, 4  ;;  %v1623_v44 = vrot.slane %v1621_v31, 5  ;;  %v1631_v45 = vrot.slane %v1629_v39, 5  ;;  %v1651_v56 = vrot.slane %v1649_v49, 5 }
  0x51   : > { %2247 = vmatmul.mubr.msk.bf16.vlgmr.msra.gmra.mrb[0].mxu0 %vm233_vm0, %v2441_v23  ;;  %v1603_v23 = vrot.slane %v1601_v15, 5 }
  0x52   : > { %2250 = vmatprep.mubr.msk.bf16.mxu0 %vm233_vm0, %v2444_v27  ;;  %2255 = vmatpush3.bf16.msra.mxu0 %v2751_v36  ;;  %v1573_v36 = vshll.u32 %v2098_v40, 16  ;;  %v1615_v27 = vshll.u32 %v2104_v8, 16  ;;  %v1596_v29 = vsel %vm2676_vm3, %v1591_v19, %v1595_v4  ;;  %v1635_v40 = vshll.u32 %v2107_v32, 16 }
  0x53   : > { %2207 = vmatmul.mubr.msk.bf16.vlgmr.msra.gmra.mrb[0].mxu1 %vm233_vm0, %v2443_v33  ;;  %v1604_v30 = vor.u32 %v1603_v23, %v1600_v22  ;;  %v2108_v33 = vld [vmem:[%s2640_s9 + $0x40] sm:$0xf]  ;;  %s2859_s9 = scalar_lea.hbm %s2946_s2, %s2128_s5 }
  0x54   : > { %v1575_v59 = vrot.slane %v1573_v36, 5  ;;  %2265 = vmatpush3.bf16.msra.mxu1 %v2626_v1  ;;  %2210 = vmatprep.mubr.msk.bf16.mxu1 %vm233_vm0, %v2447_v7  ;;  %v1568_v1 = vsel %vm2676_vm3, %v1563_v2, %v1567_v51  ;;  %v1617_v35 = vrot.slane %v1615_v27, 5  ;;  %v1640_v42 = vshrl.u32 %v2108_v33, 16 }
  0x55   : > { %v2112_v18 = vcombine.low %v1554_v11, %v1568_v1  ;;  %v1605_v7 = vrot.slane %v1604_v30, 4  ;;  %v1643_v46 = vshll.u32 %v2108_v33, 16  ;;  %v1637_v47 = vrot.slane %v1635_v40, 5 }
  0x56   : > { %v1576_v3 = vor.u32 %v1575_v59, %v1572_v58  ;;  %v1618_v43 = vor.u32 %v1617_v35, %v1614_v26  ;;  %v1642_v48 = vrot.slane %v1640_v42, 4 }
  0x57   : > { %v1610_v50 = vsel %vm2676_vm3, %v1605_v7, %v1609_v25  ;;  %v1645_v36 = vrot.slane %v1643_v46, 5 }
  0x58   : > { %v1577_v10 = vrot.slane %v1576_v3, 4  ;;  %v1619_v51 = vrot.slane %v1618_v43, 4 }
  0x59   : > { %2251 = vmatmul.mubr.msk.bf16.gmra.mrb[4].mxu0 %vm233_vm0, %v2445_v6  ;;  %v1626_v6 = vshrl.u32 %v2106_v28, 16  ;;  %v1646_v55 = vor.u32 %v1645_v36, %v1642_v48 }
  0x5a   : > { %v1582_v24 = vsel %vm2676_vm3, %v1577_v10, %v1581_v21  ;;  %2256 = vmatprep.mubr.msk.bf16.mxu0 %vm233_vm0, %v2112_v18  ;;  %v1624_v53 = vsel %vm2676_vm3, %v1619_v51, %v1623_v44 }
  0x5b   : > { %v2113_v34 = vcombine.low %v1582_v24, %v1596_v29  ;;  %2211 = vmatmul.mubr.msk.bf16.gmra.mrb[4].mxu1 %vm233_vm0, %v2448_v9  ;;  %v1628_v41 = vrot.slane %v1626_v6, 4  ;;  %v2114_v57 = vcombine.low %v1610_v50, %v1624_v53  ;;  %v1647_v59 = vrot.slane %v1646_v55, 4 }
  0x5c   : > { %2220 = vmatprep.mubr.msk.bf16.mxu1 %vm233_vm0, %v2449_v20 }
  0x5d   : > { %v1632_v52 = vor.u32 %v1631_v45, %v1628_v41  ;;  %v1652_v61 = vsel %vm2676_vm3, %v1647_v59, %v1651_v56 }
  0x5f   : > { %v1633_v54 = vrot.slane %v1632_v52, 4 }
  0x61   : > { %2257 = vmatmul.mubr.msk.bf16.vlgmr.msra.gmra.mrb[0].mxu0 %vm233_vm0, %v2113_v34  ;;  %v1638_v58 = vsel %vm2676_vm3, %v1633_v54, %v1637_v47 }
  0x62   : > { %2260 = vmatprep.mubr.msk.bf16.mxu0 %vm233_vm0, %v2114_v57  ;;  %v2115_v21 = vcombine.low %v1638_v58, %v1652_v61 }
  0x67   : > { %2221 = vmatmul.mubr.msk.bf16.vlgmr.msra.gmra.mrb[4].mxu1 %vm233_vm0, %v2450_v60 }
  0x69   : > { %2261 = vmatmul.mubr.msk.bf16.gmra.mrb[4].mxu0 %vm233_vm0, %v2115_v21 }
 0x126   : > { %v2208_v62 = vpop.f32.mrb[0].mxu1 }
 0x127   : > { %v811_v63 = vpop.f32.mrb[1].mxu1 }
 0x128   : > { %v2209_v0 = vpop.f32.mrb[2].mxu1 }
 0x129   : > { %v814_v2 = vpop.f32.mrb[3].mxu1 }
 0x134   : > { %v2258_v3 = vpop.f32.mrb[0].mxu0 }
 0x135   : > { %v2271_v4 = vadd.f32 %v2258_v3, %v2208_v62  ;;  %v1728_v5 = vpop.f32.mrb[1].mxu0 }
 0x136   : > { %v2277_v8 = vadd.f32 %v1728_v5, %v811_v63  ;;  %v2259_v9 = vpop.f32.mrb[2].mxu0 }
 0x137   : > { %1769 = vst [vmem:[%s2845_s4 + $0x10] sm:$0xff] %v2271_v4  ;;  %v2283_v38 = vadd.f32 %v2259_v9, %v2209_v0  ;;  %v1731_v11 = vpop.f32.mrb[3].mxu0 }
 0x138   : > { %1767 = vst [vmem:[%s2845_s4] sm:$0xff] %v2277_v8  ;;  %v2289_v12 = vadd.f32 %v1731_v11, %v814_v2 }
 0x139   : > { %1770 = vst [vmem:[%s2845_s4 + $0x18] sm:$0xff] %v2283_v38 }
 0x13a   : > { %1768 = vst [vmem:[%s2845_s4 + $0x8] sm:$0xff] %v2289_v12  ;;  %v2222_v13 = vpop.f32.mrb[4].mxu1 }
 0x13b   : > { %v966_v15 = vpop.f32.mrb[5].mxu1 }
 0x13c   : > { %v2262_v14 = vpop.f32.mrb[4].mxu0  ;;  %v2223_v16 = vpop.f32.mrb[6].mxu1 }
 0x13d   : > { %v1744_v1 = vpop.f32.mrb[5].mxu0  ;;  %v2295_v19 = vadd.f32 %v2262_v14, %v2222_v13  ;;  %v969_v20 = vpop.f32.mrb[7].mxu1 }
 0x13e   : > { %v2263_v17 = vpop.f32.mrb[6].mxu0  ;;  %v2301_v24 = vadd.f32 %v1744_v1, %v966_v15  ;;  %v1777_v28 = vld [vmem:[%s2845_s4 + $0x10] sm:$0xff] }
 0x13f   : > { %v1775_v10 = vld [vmem:[%s2845_s4] sm:$0xff]  ;;  %v1747_v22 = vpop.f32.mrb[7].mxu0  ;;  %1773 = vst [vmem:[%s2845_s4 + $0x30] sm:$0xff] %v2295_v19  ;;  %v2307_v27 = vadd.f32 %v2263_v17, %v2223_v16  ;;  %v1799_v33 = vmul.f32 %v1777_v28, %v1777_v28 }
 0x140   : > { %v1797_v26 = vmul.f32 %v1775_v10, %v1775_v10  ;;  %1771 = vst [vmem:[%s2845_s4 + $0x20] sm:$0xff] %v2301_v24  ;;  %v2313_v29 = vadd.f32 %v1747_v22, %v969_v20  ;;  %v1778_v31 = vld [vmem:[%s2845_s4 + $0x18] sm:$0xff] }
 0x141   : > { %v1776_v18 = vld [vmem:[%s2845_s4 + $0x8] sm:$0xff]  ;;  %1774 = vst [vmem:[%s2845_s4 + $0x38] sm:$0xff] %v2307_v27 }
 0x142   : > { %v1798_v23 = vmul.f32 %v1776_v18, %v1776_v18  ;;  %v1783_v25 = vadd.f32 %v1776_v18, %v1775_v10  ;;  %1772 = vst [vmem:[%s2845_s4 + $0x28] sm:$0xff] %v2313_v29 }
 0x144   : > { %v1805_v30 = vadd.f32 %v1798_v23, %v1797_v26  ;;  %v1784_v32 = vadd.f32 %v1783_v25, %v1777_v28 }
 0x145   : > { %2464 = shalt.err (!%p2461_p3)
}
 0x146   : > { %s2465_s24 = scalar_lea.hbm %s2859_s9, 1024  ;;  %s2469_s27 = scalar_lea.hbm %s2946_s2, 2048 }
 0x147   : > { %p2466_p4 = scmp.ne.s32.totalorder %s2859_s9, %s2465_s24  ;;  %p2470_p9 = scmp.lt.u32.totalorder %s2859_s9, %s2946_s2 }
 0x148   : > { %p2471_p10 = scmp.lt.u32.totalorder %s2469_s27, %s2465_s24  ;;  %p2473_p12 = scmp.lt.u32.totalorder %s2465_s24, %s2859_s9 }
 0x149   : > { %p2467_p7 = pnand %p2466_p4, %p2609_p5 }
 0x14a   : > { %p2472_p11 = por %p2471_p10, %p2470_p9 }
 0x14b   : > { %p2468_p8 = pneg %p2467_p7 }
 0x14c   : > { %p2474_p13 = por %p2473_p12, %p2472_p11 }
 0x14e   : > { %p2475_p0 = pnand %p2474_p13, %p2468_p8 }
 0x150   : > { %2478 = shalt.err (!%p2475_p0)
}
 0x151   : > { %s2548_s5 = smov 128   ;;  %s2549_s7 = smov 8   ;;  %v1806_v6 = vadd.f32 %v1805_v30, %v1799_v33  ;;  %v1785_v34 = vadd.f32 %v1784_v32, %v1778_v31  ;;  %v1800_v35 = vmul.f32 %v1778_v31, %v1778_v31  ;;  %v1779_v37 = vld [vmem:[%s2845_s4 + $0x20] sm:$0xff]  ;;  %v1780_v41 = vld [vmem:[%s2845_s4 + $0x28] sm:$0xff]  ;;  %v1781_v42 = vld [vmem:[%s2845_s4 + $0x30] sm:$0xff] }
 0x152   : > { %2371 = dma.vmem_to_hbm [thread:$0]  (%p2609_p5), %s2861_s6, 1024, %s2859_s9, %s1820_s10, %s2548_s5, %s2548_s5, %s2549_s7   ;;  %v1801_v40 = vmul.f32 %v1779_v37, %v1779_v37  ;;  %v1802_v44 = vmul.f32 %v1780_v41, %v1780_v41  ;;  %v1803_v48 = vmul.f32 %v1781_v42, %v1781_v42 }
 0x153   : > { %v1786_v39 = vadd.f32 %v1785_v34, %v1779_v37  ;;  %v1807_v7 = vadd.f32 %v1806_v6, %v1800_v35  ;;  %v1782_v46 = vld [vmem:[%s2845_s4 + $0x38] sm:$0xff]  ;;  %s1950_s6 = sshll.u32 %s2842_s29, 1  ;;  %s2125_s4 = sshll.u32 %s2592_s16, 5 }
 0x154   : > { %v1804_v51 = vmul.f32 %v1782_v46, %v1782_v46  ;;  %s174_s8 = scalar_lea.vmem [#allocation4], %s1950_s6  ;;  %s2901_s17 = scalar_lea.hbm %s2947_s3, %s2125_s4 }
 0x155   : > { %v1787_v43 = vadd.f32 %v1786_v39, %v1780_v41  ;;  %v1808_v45 = vadd.f32 %v1807_v7, %v1801_v40  ;;  %s1854_s9 = sshll.u32 %s174_s8, 4  ;;  %s1825_s19 = scalar_lea.sflag [#allocation5], %s2842_s29  ;;  %s2903_s9 = int_to_ptr.vmem [resolvable:$true] %s1854_s9 }
 0x156   : > { %s2479_s20 = scalar_lea.vmem %s2903_s9, 32  ;;  %s2550_s16 = smov [#allocation4]  }
 0x157   : > { %v1788_v47 = vadd.f32 %v1787_v43, %v1781_v42  ;;  %v1809_v49 = vadd.f32 %v1808_v45, %v1802_v44  ;;  %p2480_p1 = scmp.ne.s32.totalorder %s2903_s9, %s2479_s20  ;;  %s2483_s24 = sshll.u32 %s2550_s16, 4  ;;  %s2484_s24 = int_to_ptr.vmem [resolvable:$false] %s2483_s24 }
 0x158   : > { %s2485_s25 = scalar_lea.vmem %s2484_s24, 64  ;;  %p2486_p4 = scmp.lt.s32.totalorder %s2903_s9, %s2484_s24 }
 0x159   : > { %v1789_v50 = vadd.f32 %v1788_v47, %v1782_v46  ;;  %v1810_v52 = vadd.f32 %v1809_v49, %v1803_v48  ;;  %p2481_p2 = pnand %p2480_p1, %p2609_p5  ;;  %p2487_p7 = scmp.lt.s32.totalorder %s2485_s25, %s2479_s20 }
 0x15b   : > { %v1790_v36 = vrot.slane %v1789_v50, 4  ;;  %v1811_v53 = vadd.f32 %v1810_v52, %v1804_v51  ;;  %p2482_p3 = pneg %p2481_p2  ;;  %p2488_p8 = por %p2487_p7, %p2486_p4 }
 0x15d   : > { %v1791_v54 = vadd.f32 %v1790_v36, %v1789_v50  ;;  %v1812_v55 = vrot.slane %v1811_v53, 4  ;;  %p2489_p9 = pnand %p2488_p8, %p2482_p3 }
 0x15f   : > { %v1792_v56 = vrot.slane %v1791_v54, 2  ;;  %v1813_v57 = vadd.f32 %v1812_v55, %v1811_v53 }
 0x161   : > { %v1793_v58 = vadd.f32 %v1792_v56, %v1791_v54  ;;  %v1814_v59 = vrot.slane %v1813_v57, 2 }
 0x163   : > { %v1794_v60 = vrot.slane %v1793_v58, 1  ;;  %v1815_v61 = vadd.f32 %v1814_v59, %v1813_v57 }
 0x165   : > { %v1795_v21 = vadd.f32 %v1794_v60, %v1793_v58  ;;  %v1816_v62 = vrot.slane %v1815_v61, 1 }
 0x167   : > { %1796 = vst [vmem:[%s174_s8] sm:$0x1] %v1795_v21  ;;  %v1817_v63 = vadd.f32 %v1816_v62, %v1815_v61 }
 0x169   : > { %1818 = vst [vmem:[%s174_s8 + $0x1] sm:$0x1] %v1817_v63 }
 0x16a   : > { %2492 = shalt.err (!%p2489_p9)
}
 0x16b   : > { %s2493_s29 = scalar_lea.hbm %s2901_s17, 32  ;;  %s2497_s28 = scalar_lea.hbm %s2947_s3, 64 }
 0x16c   : > { %p2494_p10 = scmp.ne.s32.totalorder %s2901_s17, %s2493_s29  ;;  %p2498_p13 = scmp.lt.u32.totalorder %s2901_s17, %s2947_s3 }
 0x16d   : > { %p2499_p0 = scmp.lt.u32.totalorder %s2497_s28, %s2493_s29  ;;  %p2501_p2 = scmp.lt.u32.totalorder %s2493_s29, %s2901_s17 }
 0x16e   : > { %p2495_p11 = pnand %p2494_p10, %p2609_p5 }
 0x16f   : > { %p2500_p1 = por %p2499_p0, %p2498_p13 }
 0x170   : > { %p2496_p12 = pneg %p2495_p11 }
 0x171   : > { %p2502_p3 = por %p2501_p2, %p2500_p1 }
 0x173   : > { %p2503_p4 = pnand %p2502_p3, %p2496_p12 }
 0x175   : > { %2506 = shalt.err (!%p2503_p4)
}
 0x176   : > { %2372 = dma.vmem_to_hbm [thread:$0]  (%p2609_p5), %s2903_s9, 32, %s2901_s17, %s1825_s19  }
 0x177 PF: > { %p2382_p7 = scmp.ge.s32.totalorder %s2545_s15, 2  ;;  %s1866_s7 = sand.u32 1, %s2533_s12  }
 0x178   : > { %s1867_s6 = scalar_lea.sflag [#allocation3], %s1866_s7 }
 0x179   : > { %p2376_p8 = pnand %p2382_p7, %p2613_p6 }
 0x17b   : > { %2524 = dma.done.wait (!%p2376_p8), %s1867_s6, 1024  }
 0x17c   : > { %2526 = vsyncadd (!%p2376_p8), %s1867_s6, 4294966272  ;;  %s1876_s4 = scalar_lea.sflag [#allocation5], %s1866_s7 }
 0x17d   : > { %2528 = dma.done.wait (!%p2376_p8), %s1876_s4, 32  }
 0x17e   : > { %2530 = vsyncadd (!%p2376_p8), %s1876_s4, 4294967264  ;;  %p17_p5 = scmp.ge.s32.totalorder %s2596_s18, 4   ;;  %s2952_s12 = smov %s2537_s13 }
 0x17f   : > { %s2953_s13 = smov %s2541_s14  ;;  %s2954_s14 = smov %s2607_s21 }
 0x180   : > { %s2955_s15 = smov %s2596_s18  ;;  %19 = sbr.rel (!%p17_p5) target bundleno = 5 (0x5), region = 93 }
 0x187   :  { %1881 = vsyncpa [#allocation3], 1 }
 0x188   :  { %1883 = vsyncpa [#allocation3 + $0x1], 1 }
 0x189   :  { %1884 = vsyncpa [#allocation5], 1 }
 0x18a   :  { %1886 = vsyncpa [#allocation5 + $0x1], 1 }

</bundles_post_ra>
